<compile_context>
chip_gen: v7x
topology: tpu7x:2x2x1
jax: 0.10.0
libtpu: 0.0.40
codegen_flags: <defaults>
</compile_context>

<pallas_src>
import functools

import jax
import jax.numpy as jnp
from jax import lax
from jax.experimental import pallas as pl
from jax.experimental.pallas import tpu as pltpu


def _round_up(x: int, m: int) -> int:
    return ((x + m - 1) // m) * m


def _hbm_gather_kernel(ids_ref, table_ref, out_ref, sem, *, tn, unroll):
    """Gather `tn` rows from an HBM-resident table via per-row async DMAs.

    ids_ref:   (n_pad,) int32 in SMEM (scalar prefetch) -- flattened token ids.
    table_ref: (V, D)   embedding table left in HBM (memory_space=pl.ANY).
    out_ref:   (tn, D)  VMEM output block for this grid step.
    sem:       (1,)     shared DMA semaphore for all row copies of this block.
    """
    base = pl.program_id(0) * tn

    # Issue every row DMA first -- all SMEM id reads happen before any .wait()
    # (waits break SMEM sst->sld forwarding) -- then drain them all.
    def issue(j, carry):
        row = ids_ref[base + j]
        pltpu.make_async_copy(table_ref.at[row], out_ref.at[j], sem.at[0]).start()
        return carry

    lax.fori_loop(0, tn, issue, 0, unroll=unroll)

    def drain(j, carry):
        # The wait only needs a descriptor of matching transfer size (one row);
        # every copy above has the same size, so row 0 works for all of them.
        pltpu.make_async_copy(table_ref.at[0], out_ref.at[0], sem.at[0]).wait()
        return carry

    lax.fori_loop(0, tn, drain, 0, unroll=unroll)


def _vmem_gather_kernel(ids_ref, table_ref, out_ref, *, tn, unroll):
    """Gather `tn` rows from a VMEM-resident table with vector loads/stores.

    ids_ref:   (n_pad,) int32 in SMEM (scalar prefetch).
    table_ref: (V, D)   full table block, resident in VMEM across all steps.
    out_ref:   (tn, D)  VMEM output block.
    """
    base = pl.program_id(0) * tn

    def body(j, carry):
        row = ids_ref[base + j]
        out_ref[pl.ds(j, 1), :] = table_ref[pl.ds(row, 1), :]
        return carry

    lax.fori_loop(0, tn, body, 0, unroll=unroll)


def deep_embed(indices: jax.Array, table: jax.Array, *,
               force_resident: bool | None = None) -> jax.Array:
    """Pallas equivalent of TorchDeepEmbed.forward (row gather from the table).

    Args:
        indices: (batch, seq) integer token ids.
        table:   (vocab_size, embed_dim) embedding weights.
        force_resident: override the table-in-VMEM fast-path heuristic (testing).

    Returns:
        (batch, seq, embed_dim) embeddings in the table's dtype.
    """
    b, s = indices.shape
    v, d = table.shape
    n = b * s
    if n == 0:
        return jnp.zeros((b, s, d), table.dtype)

    itemsize = jnp.dtype(table.dtype).itemsize
    row_bytes = d * itemsize
    table_bytes = v * d * itemsize

    # Per-generation VMEM budget (v5e/v6e: 128 MiB physical, v7x: 64 MiB).
    try:
        phys_vmem = int(pltpu.get_tpu_info().vmem_capacity_bytes)
        if phys_vmem <= 0:
            raise ValueError("bad vmem capacity")
    except Exception:
        phys_vmem = 64 << 20          # conservative (v7x-sized) fallback
    budget = phys_vmem // 2           # leave plenty of headroom

    # Small-table fast path: whole table resident in VMEM (read from HBM once),
    # rows gathered with in-VMEM copies instead of tiny per-row HBM DMAs.
    if force_resident is None:
        resident = 2 * table_bytes <= budget // 2   # allow for double buffering
    else:
        resident = bool(force_resident)

    # Tokens per grid step: target ~0.5 MiB output blocks (amortizes the
    # ~0.35 us per-step overhead and keeps many row copies in flight), capped
    # so double-buffered blocks (+ resident table) fit the VMEM budget.
    target_block_bytes = 512 << 10
    tn = max(128, min(512, target_block_bytes // max(row_bytes, 1)))
    avail = budget - (2 * table_bytes if resident else 0)
    tn = min(tn, max(8, avail // max(2 * row_bytes, 1)))
    tn = min(tn, _round_up(n, 8))     # never bigger than the token count
    tn = max(8, (tn // 8) * 8)        # sublane granularity

    num_blocks = pl.cdiv(n, tn)
    n_pad = num_blocks * tn

    ids = indices.reshape(-1).astype(jnp.int32)
    # torch.nn.Embedding raises on out-of-range ids; we clamp so a stray id can
    # never address outside the table.
    # TODO(synk): surface an error for out-of-range ids instead of clamping.
    ids = jnp.clip(ids, 0, v - 1)
    if n_pad != n:
        # Padding only feeds addressing for the dropped tail rows of the last
        # output block; row 0 is always a safe address.
        ids = jnp.concatenate([ids, jnp.zeros((n_pad - n,), jnp.int32)])

    unroll = True if tn <= 32 else 8

    out_spec = pl.BlockSpec((tn, d), lambda i, _ids: (i, 0))
    if resident:
        kernel = functools.partial(_vmem_gather_kernel, tn=tn, unroll=unroll)
        table_spec = pl.BlockSpec((v, d), lambda i, _ids: (0, 0))  # fetched once
        scratch_shapes = []
        bytes_accessed = table_bytes + n * row_bytes + n_pad * 4
    else:
        kernel = functools.partial(_hbm_gather_kernel, tn=tn, unroll=unroll)
        table_spec = pl.BlockSpec(memory_space=pl.ANY)             # stays in HBM
        scratch_shapes = [pltpu.SemaphoreType.DMA((1,))]
        bytes_accessed = 2 * n * row_bytes + n_pad * 4

    needed = 2 * tn * row_bytes + (2 * table_bytes if resident else 0)
    vmem_limit = int(min(phys_vmem - phys_vmem // 8,
                         max(32 << 20, needed + (4 << 20))))

    out_flat = pl.pallas_call(
        kernel,
        # No padded output + epilogue slice: Pallas drops out-of-bounds tail
        # rows of the last (tn, d) block, so writeback stays a single pass.
        out_shape=jax.ShapeDtypeStruct((n, d), table.dtype),
        grid_spec=pltpu.PrefetchScalarGridSpec(
            num_scalar_prefetch=1,
            grid=(num_blocks,),
            in_specs=[table_spec],
            out_specs=out_spec,
            scratch_shapes=scratch_shapes,
        ),
        compiler_params=pltpu.CompilerParams(
            dimension_semantics=("parallel",),   # v7x megacore shards token blocks
            vmem_limit_bytes=vmem_limit,
        ),
        cost_estimate=pl.CostEstimate(
            flops=0, transcendentals=0, bytes_accessed=int(bytes_accessed)),
    )(ids, table)

    return out_flat.reshape(b, s, d)


if __name__ == "__main__":
    key = jax.random.PRNGKey(0)
    k_table, k_idx, k_table2, k_idx2 = jax.random.split(key, 4)

    # Case 1: spec-sized shapes (batch=2, seq=8, vocab=32, embed_dim=32).
    # Small table -> VMEM-resident fast path.
    batch, seq, vocab_size, embed_dim = 2, 8, 32, 32
    # torch.nn.Embedding default init is N(0, 1) -- match that deterministically.
    table = jax.random.normal(k_table, (vocab_size, embed_dim), dtype=jnp.float32)
    indices = jax.random.randint(k_idx, (batch, seq), 0, vocab_size, dtype=jnp.int32)
    out = jax.block_until_ready(deep_embed(indices, table))
    ref = table[indices]
    assert out.shape == (batch, seq, embed_dim), out.shape
    assert jnp.allclose(out, ref, atol=1e-6), "mismatch vs reference (resident path)"

    # Case 2: force the HBM manual-DMA path, with a token count that does not
    # divide the block size (exercises dropped OOB tail rows of the last block).
    b2, s2, v2, d2 = 3, 7, 64, 48
    table2 = jax.random.normal(k_table2, (v2, d2), dtype=jnp.float32)
    idx2 = jax.random.randint(k_idx2, (b2, s2), 0, v2, dtype=jnp.int32)
    out2 = jax.block_until_ready(deep_embed(idx2, table2, force_resident=False))
    assert out2.shape == (b2, s2, d2), out2.shape
    assert jnp.allclose(out2, table2[idx2], atol=1e-6), "mismatch (HBM DMA path)"

    # Case 3: same ragged shapes through the VMEM-resident path.
    out3 = jax.block_until_ready(deep_embed(idx2, table2, force_resident=True))
    assert jnp.allclose(out3, table2[idx2], atol=1e-6), "mismatch (resident, ragged)"

    print("KERNEL_OK")
</pallas_src>

<mosaic_0001>
module attributes {stable_mosaic.version = 11 : i64} {
  func.func @_vmem_gather_kernel(%arg0: i32, %arg1: memref<16xi32, #tpu.memory_space<smem>>, %arg2: memref<32x32xf32, #tpu.memory_space<vmem>>, %arg3: memref<16x32xf32, #tpu.memory_space<vmem>>) attributes {dimension_semantics = [#tpu.dimension_semantics<parallel>], iteration_bounds = array<i64: 1>, scalar_prefetch = 1 : i64, scratch_operands = 0 : i64, tpu.core_type = #tpu.core_type<tc>, window_params = [{pipeline_mode = #tpu.pipeline_mode<synchronous>, transform_indices = @transform_0, window_bounds = array<i64: 32, 32>}, {transform_indices = @transform_1, window_bounds = array<i64: 16, 32>}]} {
    %c16_i32 = arith.constant 16 : i32
    %0 = arith.muli %arg0, %c16_i32 : i32
    %c0_i32 = arith.constant 0 : i32
    %1 = arith.addi %0, %c0_i32 : i32
    %2 = arith.index_cast %1 : i32 to index
    %3 = memref.load %arg1[%2] : memref<16xi32, #tpu.memory_space<smem>>
    %4 = arith.index_cast %3 : i32 to index
    %c0 = arith.constant 0 : index
    %5 = vector.load %arg2[%4, %c0] : memref<32x32xf32, #tpu.memory_space<vmem>>, vector<1x32xf32>
    %6 = arith.index_cast %c0_i32 : i32 to index
    %c0_0 = arith.constant 0 : index
    %7 = vector.load %arg3[%6, %c0_0] : memref<16x32xf32, #tpu.memory_space<vmem>>, vector<1x32xf32>
    tpu.vector_store %arg3[%6, %c0_0], %5 {strides = array<i32>} : memref<16x32xf32, #tpu.memory_space<vmem>>, vector<1x32xf32>,
    %c1_i32 = arith.constant 1 : i32
    %8 = arith.addi %0, %c1_i32 : i32
    %9 = arith.index_cast %8 : i32 to index
    %10 = memref.load %arg1[%9] : memref<16xi32, #tpu.memory_space<smem>>
    %11 = arith.index_cast %10 : i32 to index
    %c0_1 = arith.constant 0 : index
    %12 = vector.load %arg2[%11, %c0_1] : memref<32x32xf32, #tpu.memory_space<vmem>>, vector<1x32xf32>
    %13 = arith.index_cast %c1_i32 : i32 to index
    %c0_2 = arith.constant 0 : index
    %14 = vector.load %arg3[%13, %c0_2] : memref<16x32xf32, #tpu.memory_space<vmem>>, vector<1x32xf32>
    tpu.vector_store %arg3[%13, %c0_2], %12 {strides = array<i32>} : memref<16x32xf32, #tpu.memory_space<vmem>>, vector<1x32xf32>,
    %c2_i32 = arith.constant 2 : i32
    %15 = arith.addi %0, %c2_i32 : i32
    %16 = arith.index_cast %15 : i32 to index
    %17 = memref.load %arg1[%16] : memref<16xi32, #tpu.memory_space<smem>>
    %18 = arith.index_cast %17 : i32 to index
    %c0_3 = arith.constant 0 : index
    %19 = vector.load %arg2[%18, %c0_3] : memref<32x32xf32, #tpu.memory_space<vmem>>, vector<1x32xf32>
    %20 = arith.index_cast %c2_i32 : i32 to index
    %c0_4 = arith.constant 0 : index
    %21 = vector.load %arg3[%20, %c0_4] : memref<16x32xf32, #tpu.memory_space<vmem>>, vector<1x32xf32>
    tpu.vector_store %arg3[%20, %c0_4], %19 {strides = array<i32>} : memref<16x32xf32, #tpu.memory_space<vmem>>, vector<1x32xf32>,
    %c3_i32 = arith.constant 3 : i32
    %22 = arith.addi %0, %c3_i32 : i32
    %23 = arith.index_cast %22 : i32 to index
    %24 = memref.load %arg1[%23] : memref<16xi32, #tpu.memory_space<smem>>
    %25 = arith.index_cast %24 : i32 to index
    %c0_5 = arith.constant 0 : index
    %26 = vector.load %arg2[%25, %c0_5] : memref<32x32xf32, #tpu.memory_space<vmem>>, vector<1x32xf32>
    %27 = arith.index_cast %c3_i32 : i32 to index
    %c0_6 = arith.constant 0 : index
    %28 = vector.load %arg3[%27, %c0_6] : memref<16x32xf32, #tpu.memory_space<vmem>>, vector<1x32xf32>
    tpu.vector_store %arg3[%27, %c0_6], %26 {strides = array<i32>} : memref<16x32xf32, #tpu.memory_space<vmem>>, vector<1x32xf32>,
    %c4_i32 = arith.constant 4 : i32
    %29 = arith.addi %0, %c4_i32 : i32
    %30 = arith.index_cast %29 : i32 to index
    %31 = memref.load %arg1[%30] : memref<16xi32, #tpu.memory_space<smem>>
    %32 = arith.index_cast %31 : i32 to index
    %c0_7 = arith.constant 0 : index
    %33 = vector.load %arg2[%32, %c0_7] : memref<32x32xf32, #tpu.memory_space<vmem>>, vector<1x32xf32>
    %34 = arith.index_cast %c4_i32 : i32 to index
    %c0_8 = arith.constant 0 : index
    %35 = vector.load %arg3[%34, %c0_8] : memref<16x32xf32, #tpu.memory_space<vmem>>, vector<1x32xf32>
    tpu.vector_store %arg3[%34, %c0_8], %33 {strides = array<i32>} : memref<16x32xf32, #tpu.memory_space<vmem>>, vector<1x32xf32>,
    %c5_i32 = arith.constant 5 : i32
    %36 = arith.addi %0, %c5_i32 : i32
    %37 = arith.index_cast %36 : i32 to index
    %38 = memref.load %arg1[%37] : memref<16xi32, #tpu.memory_space<smem>>
    %39 = arith.index_cast %38 : i32 to index
    %c0_9 = arith.constant 0 : index
    %40 = vector.load %arg2[%39, %c0_9] : memref<32x32xf32, #tpu.memory_space<vmem>>, vector<1x32xf32>
    %41 = arith.index_cast %c5_i32 : i32 to index
    %c0_10 = arith.constant 0 : index
    %42 = vector.load %arg3[%41, %c0_10] : memref<16x32xf32, #tpu.memory_space<vmem>>, vector<1x32xf32>
    tpu.vector_store %arg3[%41, %c0_10], %40 {strides = array<i32>} : memref<16x32xf32, #tpu.memory_space<vmem>>, vector<1x32xf32>,
    %c6_i32 = arith.constant 6 : i32
    %43 = arith.addi %0, %c6_i32 : i32
    %44 = arith.index_cast %43 : i32 to index
    %45 = memref.load %arg1[%44] : memref<16xi32, #tpu.memory_space<smem>>
    %46 = arith.index_cast %45 : i32 to index
    %c0_11 = arith.constant 0 : index
    %47 = vector.load %arg2[%46, %c0_11] : memref<32x32xf32, #tpu.memory_space<vmem>>, vector<1x32xf32>
    %48 = arith.index_cast %c6_i32 : i32 to index
    %c0_12 = arith.constant 0 : index
    %49 = vector.load %arg3[%48, %c0_12] : memref<16x32xf32, #tpu.memory_space<vmem>>, vector<1x32xf32>
    tpu.vector_store %arg3[%48, %c0_12], %47 {strides = array<i32>} : memref<16x32xf32, #tpu.memory_space<vmem>>, vector<1x32xf32>,
    %c7_i32 = arith.constant 7 : i32
    %50 = arith.addi %0, %c7_i32 : i32
    %51 = arith.index_cast %50 : i32 to index
    %52 = memref.load %arg1[%51] : memref<16xi32, #tpu.memory_space<smem>>
    %53 = arith.index_cast %52 : i32 to index
    %c0_13 = arith.constant 0 : index
    %54 = vector.load %arg2[%53, %c0_13] : memref<32x32xf32, #tpu.memory_space<vmem>>, vector<1x32xf32>
    %55 = arith.index_cast %c7_i32 : i32 to index
    %c0_14 = arith.constant 0 : index
    %56 = vector.load %arg3[%55, %c0_14] : memref<16x32xf32, #tpu.memory_space<vmem>>, vector<1x32xf32>
    tpu.vector_store %arg3[%55, %c0_14], %54 {strides = array<i32>} : memref<16x32xf32, #tpu.memory_space<vmem>>, vector<1x32xf32>,
    %c8_i32 = arith.constant 8 : i32
    %57 = arith.addi %0, %c8_i32 : i32
    %58 = arith.index_cast %57 : i32 to index
    %59 = memref.load %arg1[%58] : memref<16xi32, #tpu.memory_space<smem>>
    %60 = arith.index_cast %59 : i32 to index
    %c0_15 = arith.constant 0 : index
    %61 = vector.load %arg2[%60, %c0_15] : memref<32x32xf32, #tpu.memory_space<vmem>>, vector<1x32xf32>
    %62 = arith.index_cast %c8_i32 : i32 to index
    %c0_16 = arith.constant 0 : index
    %63 = vector.load %arg3[%62, %c0_16] : memref<16x32xf32, #tpu.memory_space<vmem>>, vector<1x32xf32>
    tpu.vector_store %arg3[%62, %c0_16], %61 {strides = array<i32>} : memref<16x32xf32, #tpu.memory_space<vmem>>, vector<1x32xf32>,
    %c9_i32 = arith.constant 9 : i32
    %64 = arith.addi %0, %c9_i32 : i32
    %65 = arith.index_cast %64 : i32 to index
    %66 = memref.load %arg1[%65] : memref<16xi32, #tpu.memory_space<smem>>
    %67 = arith.index_cast %66 : i32 to index
    %c0_17 = arith.constant 0 : index
    %68 = vector.load %arg2[%67, %c0_17] : memref<32x32xf32, #tpu.memory_space<vmem>>, vector<1x32xf32>
    %69 = arith.index_cast %c9_i32 : i32 to index
    %c0_18 = arith.constant 0 : index
    %70 = vector.load %arg3[%69, %c0_18] : memref<16x32xf32, #tpu.memory_space<vmem>>, vector<1x32xf32>
    tpu.vector_store %arg3[%69, %c0_18], %68 {strides = array<i32>} : memref<16x32xf32, #tpu.memory_space<vmem>>, vector<1x32xf32>,
    %c10_i32 = arith.constant 10 : i32
    %71 = arith.addi %0, %c10_i32 : i32
    %72 = arith.index_cast %71 : i32 to index
    %73 = memref.load %arg1[%72] : memref<16xi32, #tpu.memory_space<smem>>
    %74 = arith.index_cast %73 : i32 to index
    %c0_19 = arith.constant 0 : index
    %75 = vector.load %arg2[%74, %c0_19] : memref<32x32xf32, #tpu.memory_space<vmem>>, vector<1x32xf32>
    %76 = arith.index_cast %c10_i32 : i32 to index
    %c0_20 = arith.constant 0 : index
    %77 = vector.load %arg3[%76, %c0_20] : memref<16x32xf32, #tpu.memory_space<vmem>>, vector<1x32xf32>
    tpu.vector_store %arg3[%76, %c0_20], %75 {strides = array<i32>} : memref<16x32xf32, #tpu.memory_space<vmem>>, vector<1x32xf32>,
    %c11_i32 = arith.constant 11 : i32
    %78 = arith.addi %0, %c11_i32 : i32
    %79 = arith.index_cast %78 : i32 to index
    %80 = memref.load %arg1[%79] : memref<16xi32, #tpu.memory_space<smem>>
    %81 = arith.index_cast %80 : i32 to index
    %c0_21 = arith.constant 0 : index
    %82 = vector.load %arg2[%81, %c0_21] : memref<32x32xf32, #tpu.memory_space<vmem>>, vector<1x32xf32>
    %83 = arith.index_cast %c11_i32 : i32 to index
    %c0_22 = arith.constant 0 : index
    %84 = vector.load %arg3[%83, %c0_22] : memref<16x32xf32, #tpu.memory_space<vmem>>, vector<1x32xf32>
    tpu.vector_store %arg3[%83, %c0_22], %82 {strides = array<i32>} : memref<16x32xf32, #tpu.memory_space<vmem>>, vector<1x32xf32>,
    %c12_i32 = arith.constant 12 : i32
    %85 = arith.addi %0, %c12_i32 : i32
    %86 = arith.index_cast %85 : i32 to index
    %87 = memref.load %arg1[%86] : memref<16xi32, #tpu.memory_space<smem>>
    %88 = arith.index_cast %87 : i32 to index
    %c0_23 = arith.constant 0 : index
    %89 = vector.load %arg2[%88, %c0_23] : memref<32x32xf32, #tpu.memory_space<vmem>>, vector<1x32xf32>
    %90 = arith.index_cast %c12_i32 : i32 to index
    %c0_24 = arith.constant 0 : index
    %91 = vector.load %arg3[%90, %c0_24] : memref<16x32xf32, #tpu.memory_space<vmem>>, vector<1x32xf32>
    tpu.vector_store %arg3[%90, %c0_24], %89 {strides = array<i32>} : memref<16x32xf32, #tpu.memory_space<vmem>>, vector<1x32xf32>,
    %c13_i32 = arith.constant 13 : i32
    %92 = arith.addi %0, %c13_i32 : i32
    %93 = arith.index_cast %92 : i32 to index
    %94 = memref.load %arg1[%93] : memref<16xi32, #tpu.memory_space<smem>>
    %95 = arith.index_cast %94 : i32 to index
    %c0_25 = arith.constant 0 : index
    %96 = vector.load %arg2[%95, %c0_25] : memref<32x32xf32, #tpu.memory_space<vmem>>, vector<1x32xf32>
    %97 = arith.index_cast %c13_i32 : i32 to index
    %c0_26 = arith.constant 0 : index
    %98 = vector.load %arg3[%97, %c0_26] : memref<16x32xf32, #tpu.memory_space<vmem>>, vector<1x32xf32>
    tpu.vector_store %arg3[%97, %c0_26], %96 {strides = array<i32>} : memref<16x32xf32, #tpu.memory_space<vmem>>, vector<1x32xf32>,
    %c14_i32 = arith.constant 14 : i32
    %99 = arith.addi %0, %c14_i32 : i32
    %100 = arith.index_cast %99 : i32 to index
    %101 = memref.load %arg1[%100] : memref<16xi32, #tpu.memory_space<smem>>
    %102 = arith.index_cast %101 : i32 to index
    %c0_27 = arith.constant 0 : index
    %103 = vector.load %arg2[%102, %c0_27] : memref<32x32xf32, #tpu.memory_space<vmem>>, vector<1x32xf32>
    %104 = arith.index_cast %c14_i32 : i32 to index
    %c0_28 = arith.constant 0 : index
    %105 = vector.load %arg3[%104, %c0_28] : memref<16x32xf32, #tpu.memory_space<vmem>>, vector<1x32xf32>
    tpu.vector_store %arg3[%104, %c0_28], %103 {strides = array<i32>} : memref<16x32xf32, #tpu.memory_space<vmem>>, vector<1x32xf32>,
    %c15_i32 = arith.constant 15 : i32
    %106 = arith.addi %0, %c15_i32 : i32
    %107 = arith.index_cast %106 : i32 to index
    %108 = memref.load %arg1[%107] : memref<16xi32, #tpu.memory_space<smem>>
    %109 = arith.index_cast %108 : i32 to index
    %c0_29 = arith.constant 0 : index
    %110 = vector.load %arg2[%109, %c0_29] : memref<32x32xf32, #tpu.memory_space<vmem>>, vector<1x32xf32>
    %111 = arith.index_cast %c15_i32 : i32 to index
    %c0_30 = arith.constant 0 : index
    %112 = vector.load %arg3[%111, %c0_30] : memref<16x32xf32, #tpu.memory_space<vmem>>, vector<1x32xf32>
    tpu.vector_store %arg3[%111, %c0_30], %110 {strides = array<i32>} : memref<16x32xf32, #tpu.memory_space<vmem>>, vector<1x32xf32>,
    %c16_i32_31 = arith.constant 16 : i32
    return
  }
  func.func @transform_0(%arg0: i32, %arg1: memref<16xi32, #tpu.memory_space<smem>>) -> (i32, i32) {
    %c0_i32 = arith.constant 0 : i32
    %c0_i32_0 = arith.constant 0 : i32
    %c0_i32_1 = arith.constant 0 : i32
    return %c0_i32, %c0_i32_0 : i32, i32
  }
  func.func @transform_1(%arg0: i32, %arg1: memref<16xi32, #tpu.memory_space<smem>>) -> (i32, i32) {
    %c0_i32 = arith.constant 0 : i32
    %c0_i32_0 = arith.constant 0 : i32
    return %arg0, %c0_i32 : i32, i32
  }
}

</mosaic_0001>

<bundles_post_ra>
// kernel: tpu_custom_call.1
= control target key start
LH: loop header
LB: loop body
LE: loop exit
PB: predicated region body
PF: predicated region fallthrough
CT: control target
= control target key end

     0   :  { %s312_s0 = inlined_call_operand.hbm [shape: s32[16], index: 0, kind: input, shape index: {}]   ;;  %s313_s1 = inlined_call_operand.hbm [shape: f32[32,32], index: 1, kind: input, shape index: {}]   ;;  %s314_s2 = inlined_call_operand.hbm [shape: f32[16,32], index: 2, kind: output, shape index: {}]  }
   0x1   :  { %s162_s11 = scalar_lea.hbm %s312_s0, 16 }
   0x2   :  { %p163_p0 = scmp.ne.s32.totalorder %s312_s0, %s162_s11  ;;  %p166_p1 = scmp.lt.u32.totalorder %s162_s11, %s312_s0 }
   0x4   :  { %p168_p2 = pnand %p166_p1, %p163_p0 }
   0x6   :  { %171 = shalt.err (!%p168_p2)  }
   0x7   :  { %s222_s16 = smov [#allocation3]  }
   0x8   :  { %8 = dma.hbm_to_smem %s312_s0, 16, %s222_s16, [#allocation2] }
   0x9   :  { %216 = dma.done.wait [#allocation2], 16 }
   0xa   :  { %217 = vsyncadd [#allocation2], 4294967280 }
   0xb   :  { %10 = sfence }
   0xc   :  { %11 = vsyncpa [#allocation5], 0 }
   0xd   :  { %12 = vsyncpa [#allocation6], 0  ;;  %s223_s19 = smov [#allocation4]   ;;  %s172_s23 = scalar_lea.hbm %s313_s1, 512 }
   0xe   :  { %s18_s20 = sshll.u32 %s223_s19, 4  ;;  %p173_p3 = scmp.ne.s32.totalorder %s313_s1, %s172_s23  ;;  %s19_s20 = int_to_ptr.vmem [resolvable:$true] %s18_s20 }
   0xf   :  { %p176_p4 = scmp.lt.u32.totalorder %s172_s23, %s313_s1 }
  0x11   :  { %p178_p5 = pnand %p176_p4, %p173_p3 }
  0x13   :  { %181 = shalt.err (!%p178_p5)
}
  0x14   :  { %s182_s0 = scalar_lea.vmem %s19_s20, 512  ;;  %p187_p7 = scmp.lt.s32.totalorder %s19_s20, %s19_s20 }
  0x15   :  { %p183_p6 = scmp.ne.s32.totalorder %s19_s20, %s182_s0  ;;  %p188_p8 = scmp.lt.s32.totalorder %s182_s0, %s182_s0 }
  0x17   :  { %p189_p9 = por %p188_p8, %p187_p7 }
  0x19   :  { %p190_p10 = pnand %p189_p9, %p183_p6 }
  0x1b   :  { %193 = shalt.err (!%p190_p10)
}
  0x1c   :  { %s224_s28 = smov 128   ;;  %s225_s29 = smov 8  }
  0x1d   :  { %24 = dma.hbm_to_vmem [thread:$0]  %s313_s1, 512, %s19_s20, [#allocation5], %s224_s28, %s224_s28, %s225_s29  }
  0x1e   :  { %218 = dma.done.wait [#allocation5], 512  }
  0x1f   :  { %219 = vsyncadd [#allocation5], 4294966784  ;;  %s29_s4 = sld [smem:[#allocation3]]  ;;  %s142_s5 = sld [smem:[#allocation3 + $0x1]]  ;;  %vm32_vm0 = vcmask 253952  }
  0x20   :  { %s143_s6 = sld [smem:[#allocation3 + $0x2]]  ;;  %s144_s7 = sld [smem:[#allocation3 + $0x3]] }
  0x21   :  { %s145_s8 = sld [smem:[#allocation3 + $0x4]]  ;;  %s146_s9 = sld [smem:[#allocation3 + $0x5]] }
  0x22   :  { %s147_s10 = sld [smem:[#allocation3 + $0x6]]  ;;  %s148_s11 = sld [smem:[#allocation3 + $0x7]] }
  0x23   :  { %s269_s12 = sld [smem:[#allocation3 + $0x8]]  ;;  %s271_s13 = sld [smem:[#allocation3 + $0x9]] }
  0x24   :  { %s273_s14 = sld [smem:[#allocation3 + $0xa]]  ;;  %s275_s15 = sld [smem:[#allocation3 + $0xb]] }
  0x25   :  { %s30_s1 = scalar_lea.vmem [#allocation4], %s29_s4  ;;  %s36_s16 = scalar_lea.vmem [#allocation4], %s142_s5 }
  0x26   :  { %v31_v0 = vld [vmem:[%s30_s1] sm:$0x1]  ;;  %s41_s17 = scalar_lea.vmem [#allocation4], %s143_s6  ;;  %s46_s18 = scalar_lea.vmem [#allocation4], %s144_s7 }
  0x27   :  { %v37_v1 = vld [vmem:[%s36_s16] sm:$0x1]  ;;  %33 = vst.msk [vmem:[#allocation7] sm:$0x1] %vm32_vm0, %v31_v0  ;;  %s51_s19 = scalar_lea.vmem [#allocation4], %s145_s8  ;;  %s56_s20 = scalar_lea.vmem [#allocation4], %s146_s9 }
  0x28   :  { %38 = vst.msk [vmem:[#allocation7 + $0x1] sm:$0x1] %vm32_vm0, %v37_v1  ;;  %v42_v2 = vld [vmem:[%s41_s17] sm:$0x1]  ;;  %s61_s21 = scalar_lea.vmem [#allocation4], %s147_s10  ;;  %s66_s22 = scalar_lea.vmem [#allocation4], %s148_s11 }
  0x29   :  { %v47_v3 = vld [vmem:[%s46_s18] sm:$0x1]  ;;  %43 = vst.msk [vmem:[#allocation7 + $0x2] sm:$0x1] %vm32_vm0, %v42_v2  ;;  %s71_s23 = scalar_lea.vmem [#allocation4], %s269_s12  ;;  %s76_s24 = scalar_lea.vmem [#allocation4], %s271_s13 }
  0x2a   :  { %48 = vst.msk [vmem:[#allocation7 + $0x3] sm:$0x1] %vm32_vm0, %v47_v3  ;;  %v52_v4 = vld [vmem:[%s51_s19] sm:$0x1]  ;;  %s81_s25 = scalar_lea.vmem [#allocation4], %s273_s14  ;;  %s86_s26 = scalar_lea.vmem [#allocation4], %s275_s15 }
  0x2b   :  { %v57_v5 = vld [vmem:[%s56_s20] sm:$0x1]  ;;  %53 = vst.msk [vmem:[#allocation7 + $0x4] sm:$0x1] %vm32_vm0, %v52_v4  ;;  %s153_s27 = sld [smem:[#allocation3 + $0xc]]  ;;  %s154_s0 = sld [smem:[#allocation3 + $0xd]] }
  0x2c   :  { %58 = vst.msk [vmem:[#allocation7 + $0x5] sm:$0x1] %vm32_vm0, %v57_v5  ;;  %v62_v6 = vld [vmem:[%s61_s21] sm:$0x1]  ;;  %s155_s30 = sld [smem:[#allocation3 + $0xe]]  ;;  %s156_s3 = sld [smem:[#allocation3 + $0xf]] }
  0x2d   :  { %v67_v7 = vld [vmem:[%s66_s22] sm:$0x1]  ;;  %63 = vst.msk [vmem:[#allocation7 + $0x6] sm:$0x1] %vm32_vm0, %v62_v6  ;;  %s226_s4 = smov [#allocation7]  }
  0x2e   :  { %68 = vst.msk [vmem:[#allocation7 + $0x7] sm:$0x1] %vm32_vm0, %v67_v7  ;;  %v72_v8 = vld [vmem:[%s71_s23] sm:$0x1]  ;;  %s114_s5 = sshll.u32 %s226_s4, 4  ;;  %s115_s5 = int_to_ptr.vmem [resolvable:$true] %s114_s5 }
  0x2f   :  { %v77_v9 = vld [vmem:[%s76_s24] sm:$0x1]  ;;  %73 = vst.msk [vmem:[#allocation7 + $0x8] sm:$0x1] %vm32_vm0, %v72_v8  ;;  %s194_s10 = scalar_lea.vmem %s115_s5, 256  ;;  %p199_p12 = scmp.lt.s32.totalorder %s115_s5, %s115_s5 }
  0x30   :  { %78 = vst.msk [vmem:[#allocation7 + $0x9] sm:$0x1] %vm32_vm0, %v77_v9  ;;  %v82_v10 = vld [vmem:[%s81_s25] sm:$0x1]  ;;  %p195_p11 = scmp.ne.s32.totalorder %s115_s5, %s194_s10  ;;  %p200_p13 = scmp.lt.s32.totalorder %s194_s10, %s194_s10 }
  0x31   :  { %v87_v11 = vld [vmem:[%s86_s26] sm:$0x1]  ;;  %83 = vst.msk [vmem:[#allocation7 + $0xa] sm:$0x1] %vm32_vm0, %v82_v10  ;;  %s91_s6 = scalar_lea.vmem [#allocation4], %s153_s27  ;;  %s96_s7 = scalar_lea.vmem [#allocation4], %s154_s0 }
  0x32   :  { %88 = vst.msk [vmem:[#allocation7 + $0xb] sm:$0x1] %vm32_vm0, %v87_v11  ;;  %v92_v12 = vld [vmem:[%s91_s6] sm:$0x1]  ;;  %s101_s8 = scalar_lea.vmem [#allocation4], %s155_s30  ;;  %s106_s9 = scalar_lea.vmem [#allocation4], %s156_s3 }
  0x33   :  { %93 = vst.msk [vmem:[#allocation7 + $0xc] sm:$0x1] %vm32_vm0, %v92_v12  ;;  %v97_v13 = vld [vmem:[%s96_s7] sm:$0x1]  ;;  %p201_p0 = por %p200_p13, %p199_p12 }
  0x34   :  { %v102_v14 = vld [vmem:[%s101_s8] sm:$0x1]  ;;  %98 = vst.msk [vmem:[#allocation7 + $0xd] sm:$0x1] %vm32_vm0, %v97_v13 }
  0x35   :  { %103 = vst.msk [vmem:[#allocation7 + $0xe] sm:$0x1] %vm32_vm0, %v102_v14  ;;  %v107_v15 = vld [vmem:[%s106_s9] sm:$0x1]  ;;  %p202_p1 = pnand %p201_p0, %p195_p11 }
  0x36   :  { %108 = vst.msk [vmem:[#allocation7 + $0xf] sm:$0x1] %vm32_vm0, %v107_v15 }
  0x37   :  { %205 = shalt.err (!%p202_p1)
}
  0x38   :  { %s206_s13 = scalar_lea.hbm %s314_s2, 256 }
  0x39   :  { %p207_p2 = scmp.ne.s32.totalorder %s314_s2, %s206_s13  ;;  %p210_p3 = scmp.lt.u32.totalorder %s206_s13, %s314_s2 }
  0x3b   :  { %p212_p4 = pnand %p210_p3, %p207_p2 }
  0x3d   :  { %215 = shalt.err (!%p212_p4)
}
  0x3e   :  { %120 = dma.vmem_to_hbm [thread:$0]  %s115_s5, 256, %s314_s2, [#allocation6], %s224_s28, %s224_s28, %s225_s29  }
  0x3f   :  { %220 = dma.done.wait [#allocation6], 256  }
  0x40   :  { %221 = vsyncadd [#allocation6], 4294967040 }
  0x41   :  { %124 = vsyncpa [#allocation5], 1 }
  0x42   :  { %125 = vsyncpa [#allocation6], 1 }

</bundles_post_ra>
